<compile_context>
chip_gen: v6e
topology: v6e:2x2x1
jax: 0.10.0
libtpu: 0.0.40
codegen_flags: <defaults>
</compile_context>

<pallas_src>
import jax
import jax.numpy as jnp
from jax.experimental import pallas as pl
from jax.experimental.pallas import tpu as pltpu


LANE = 128  # TPU lane width; class dim and hidden chunks are 128-aligned.


def _round_up(x: int, m: int) -> int:
    return ((x + m - 1) // m) * m


def _classifier_head_kernel(x_ref, w1_ref, b1_ref, w2_ref, b2_ref, o_ref, acc_ref):
    # Grid: (i = B tiles [parallel], k = hidden chunks [arbitrary]).
    # x_ref : (tm, H)     f32/bf16  CLS-token rows (cols [0, H) of flattened features)
    # w1_ref: (H, tk)     bf16      dense weight chunk (stored (in, out))
    # b1_ref: (1, tk)     f32       dense bias chunk
    # w2_ref: (tk, Cp)    bf16      out_proj weight chunk, zero-padded to Cp = 128
    # b2_ref: (1, Cp)     f32       out_proj bias, zero-padded
    # o_ref : (tm, Cp)              logits tile
    # acc_ref:(tm, Cp)    f32       accumulator over hidden chunks
    k = pl.program_id(1)

    @pl.when(k == 0)
    def _():
        acc_ref[...] = jnp.zeros_like(acc_ref)

    # Dropout is identity in eval mode.  Cast to bf16 in-kernel (fused w/ load).
    x = x_ref[...].astype(jnp.bfloat16)
    h = jnp.tanh(
        jnp.dot(x, w1_ref[...], preferred_element_type=jnp.float32) + b1_ref[...]
    )
    acc_ref[...] += jnp.dot(
        h.astype(jnp.bfloat16), w2_ref[...], preferred_element_type=jnp.float32
    )

    @pl.when(k == pl.num_programs(1) - 1)
    def _():
        o_ref[...] = (acc_ref[...] + b2_ref[...]).astype(o_ref.dtype)


def anxiety_classifier_forward(features, w_dense, b_dense, w_out, b_out, *,
                               block_b=512, out_dtype=jnp.float32,
                               w1_chunk_budget_bytes=16 << 20):
    """features: (B, S, H). Weights stored (in, out). Returns (B, C) logits."""
    B, S, H = features.shape
    C = w_out.shape[1]

    # ---- CLS slice: fuse into the kernel DMA when the row is lane-aligned ----
    if H % LANE == 0:
        # Free reshape of the contiguous (B, S, H) array; the x BlockSpec below
        # only DMAs columns [0, H) of each row == token 0.
        x2d = features.reshape(B, S * H)
    else:
        # (tm, H) block of the flattened view would break the (8,128) rule.
        x2d = features[:, 0, :]

    w1 = w_dense.astype(jnp.bfloat16)
    w2 = w_out.astype(jnp.bfloat16)
    b1 = b_dense.reshape(1, H).astype(jnp.float32)
    b2 = b_out.reshape(1, C).astype(jnp.float32)

    # Lane-dense output: pad the tiny class dim (8) to a full 128-lane slab.
    c_pad = _round_up(max(C, LANE), LANE)
    w2 = jnp.pad(w2, ((0, 0), (0, c_pad - C)))
    b2 = jnp.pad(b2, ((0, 0), (0, c_pad - C)))

    # ---- B tiling: no wrapper pad; ragged edge block is masked by Pallas. ----
    # Aim for >= 2 grid steps so the "parallel" axis can use both v7x cores,
    # while keeping tiles big enough to amortize ~0.35 us/step overhead.
    if B <= 8:
        tm = B                                   # single block == full batch
    else:
        tm = min(block_b, max(8, _round_up(pl.cdiv(B, 2), 8)))
        tm = min(tm, (B // 8) * 8)               # keep tm <= B (ragged tail ok)
    nbt = pl.cdiv(B, tm)

    # ---- hidden-dim chunking: bound per-step weight VMEM at very large H. ----
    tk = H
    if H % LANE == 0:
        while (tk % 2 == 0 and (tk // 2) % LANE == 0
               and H * tk * 2 > w1_chunk_budget_bytes):
            tk //= 2                              # tk always divides H here
    nk = pl.cdiv(H, tk)

    weights_resident = (nk == 1)                  # w1/b1/w2 never change blocks
    x_resident = (nbt == 1)                       # x never changes blocks

    def spec(shape, index_map, *, single_buffer):
        if single_buffer:
            # Constant index_map -> block is fetched once; a second pipeline
            # buffer would be pure VMEM waste (8 MiB for bf16 W1 at H=2048).
            return pl.BlockSpec(shape, index_map, pipeline_mode=pl.Buffered(1))
        return pl.BlockSpec(shape, index_map)

    in_specs = [
        spec((tm, H), lambda i, k: (i, 0), single_buffer=x_resident),     # x (CLS)
        spec((H, tk), lambda i, k: (0, k), single_buffer=weights_resident),   # w1
        spec((1, tk), lambda i, k: (0, k), single_buffer=weights_resident),   # b1
        spec((tk, c_pad), lambda i, k: (k, 0), single_buffer=weights_resident),  # w2
        spec((1, c_pad), lambda i, k: (0, 0), single_buffer=True),            # b2
    ]
    out_spec = pl.BlockSpec((tm, c_pad), lambda i, k: (i, 0))

    # ---- explicit VMEM budget from the per-step footprint ----
    x_bytes = x2d.dtype.itemsize
    out_bytes = jnp.dtype(out_dtype).itemsize
    nbuf_x = 1 if x_resident else 2
    nbuf_w = 1 if weights_resident else 2
    footprint = (tm * H * x_bytes * nbuf_x            # x tile(s)
                 + H * tk * 2 * nbuf_w                # w1 chunk(s), bf16
                 + tk * 4 * nbuf_w                    # b1
                 + tk * c_pad * 2 * nbuf_w            # w2 chunk(s), bf16
                 + c_pad * 4                          # b2
                 + 2 * tm * c_pad * out_bytes         # out tile (double-buffered)
                 + tm * c_pad * 4                     # f32 accumulator scratch
                 + tm * tk * 4 + tm * H * 2)          # h / bf16(x) intermediates
    vmem_limit = min(max(int(footprint * 1.25) + (2 << 20), 16 << 20), 96 << 20)

    w_passes = 1 if nk == 1 else nbt                  # chunked W streams per B tile
    cost = pl.CostEstimate(
        flops=2 * B * H * H + 2 * B * H * c_pad,
        transcendentals=B * H,                        # tanh
        bytes_accessed=(B * H * x_bytes
                        + w_passes * (H * H * 2 + H * 4 + H * c_pad * 2)
                        + c_pad * 4
                        + B * c_pad * out_bytes),
    )

    out = pl.pallas_call(
        _classifier_head_kernel,
        out_shape=jax.ShapeDtypeStruct((B, c_pad), out_dtype),
        grid_spec=pltpu.PrefetchScalarGridSpec(
            num_scalar_prefetch=0,
            grid=(nbt, nk),
            in_specs=in_specs,
            out_specs=out_spec,
            scratch_shapes=[pltpu.VMEM((tm, c_pad), jnp.float32)],
        ),
        compiler_params=pltpu.CompilerParams(
            # B tiles shard across v7x's two TensorCores; hidden chunks are a
            # reduction (accumulator carried in VMEM scratch).
            dimension_semantics=("parallel", "arbitrary"),
            vmem_limit_bytes=vmem_limit,
        ),
        cost_estimate=cost,
    )(x2d, w1, b1, w2, b2)

    # TODO(synk): if profiling on v5e shows HBM-write-bound behavior and f32
    # logits aren't required downstream, call with out_dtype=jnp.bfloat16.
    return out[:, :C]


def init_params(key, hidden_size, num_labels=8):
    """Deterministic init mimicking torch.nn.Linear defaults (uniform +-1/sqrt(fan_in))."""
    k1, k2, k3, k4 = jax.random.split(key, 4)
    lim = 1.0 / jnp.sqrt(hidden_size)
    # stored as (in, out) so the kernel does x @ W directly
    w_dense = jax.random.uniform(k1, (hidden_size, hidden_size), jnp.float32, -lim, lim)
    b_dense = jax.random.uniform(k2, (1, hidden_size), jnp.float32, -lim, lim)
    w_out = jax.random.uniform(k3, (hidden_size, num_labels), jnp.float32, -lim, lim)
    b_out = jax.random.uniform(k4, (1, num_labels), jnp.float32, -lim, lim)
    return w_dense, b_dense, w_out, b_out


def reference_forward_f32(features, w_dense, b_dense, w_out, b_out):
    x = features[:, 0, :]
    h = jnp.tanh(x @ w_dense + b_dense)
    return h @ w_out + b_out


def reference_forward_bf16(features, w_dense, b_dense, w_out, b_out):
    # Same bf16-operand / f32-accumulate numerics as the kernel.
    x = features[:, 0, :].astype(jnp.bfloat16)
    w1 = w_dense.astype(jnp.bfloat16)
    w2 = w_out.astype(jnp.bfloat16)
    h = jnp.tanh(jnp.dot(x, w1, preferred_element_type=jnp.float32) + b_dense)
    return jnp.dot(h.astype(jnp.bfloat16), w2, preferred_element_type=jnp.float32) + b_out


if __name__ == "__main__":
    NUM_LABELS = 8
    master_key = jax.random.PRNGKey(0)

    def run_case(B, S, H):
        case_key = jax.random.fold_in(master_key, B * 10000 + S * 100 + H)
        k_feat, k_param = jax.random.split(case_key)
        features = jax.random.normal(k_feat, (B, S, H), jnp.float32)
        w_dense, b_dense, w_out, b_out = init_params(k_param, H, NUM_LABELS)

        logits = anxiety_classifier_forward(features, w_dense, b_dense, w_out, b_out)
        logits = jax.block_until_ready(logits)
        assert logits.shape == (B, NUM_LABELS)

        ref_bf16 = reference_forward_bf16(features, w_dense, b_dense, w_out, b_out)
        ref_f32 = reference_forward_f32(features, w_dense, b_dense, w_out, b_out)
        assert jnp.allclose(logits, ref_bf16, atol=2e-3, rtol=2e-3), \
            f"mismatch vs bf16 reference (B={B}, S={S}, H={H})"
        assert jnp.allclose(logits, ref_f32, atol=5e-2, rtol=5e-2), \
            f"mismatch vs f32 reference (B={B}, S={S}, H={H})"

    run_case(2, 8, 128)    # fused CLS path (H % 128 == 0), single block
    run_case(10, 4, 128)   # fused CLS path + ragged B tail (tm=8, 2 grid steps)
    run_case(2, 8, 32)     # fallback path (H % 128 != 0): wrapper-side CLS slice

    print("KERNEL_OK")
</pallas_src>

<mosaic_0001>
module attributes {stable_mosaic.version = 11 : i64} {
  func.func @_classifier_head_kernel(%arg0: i32, %arg1: i32, %arg2: memref<2x128xf32, #tpu.memory_space<vmem>>, %arg3: memref<128x128xbf16, #tpu.memory_space<vmem>>, %arg4: memref<1x128xf32, #tpu.memory_space<vmem>>, %arg5: memref<128x128xbf16, #tpu.memory_space<vmem>>, %arg6: memref<1x128xf32, #tpu.memory_space<vmem>>, %arg7: memref<2x128xf32, #tpu.memory_space<vmem>>, %arg8: memref<2x128xf32, #tpu.memory_space<vmem>>) attributes {dimension_semantics = [#tpu.dimension_semantics<parallel>, #tpu.dimension_semantics<arbitrary>], iteration_bounds = array<i64: 1, 1>, scalar_prefetch = 0 : i64, scratch_operands = 1 : i64, tpu.core_type = #tpu.core_type<tc>, window_params = [{pipeline_mode = #tpu.pipeline_mode<synchronous>, transform_indices = @transform_0, window_bounds = array<i64: 2, 128>}, {pipeline_mode = #tpu.pipeline_mode<synchronous>, transform_indices = @transform_1, window_bounds = array<i64: 128, 128>}, {pipeline_mode = #tpu.pipeline_mode<synchronous>, transform_indices = @transform_2, window_bounds = array<i64: 1, 128>}, {pipeline_mode = #tpu.pipeline_mode<synchronous>, transform_indices = @transform_3, window_bounds = array<i64: 128, 128>}, {pipeline_mode = #tpu.pipeline_mode<synchronous>, transform_indices = @transform_4, window_bounds = array<i64: 1, 128>}, {transform_indices = @transform_5, window_bounds = array<i64: 2, 128>}]} {
    %c0_i32 = arith.constant 0 : i32
    %0 = arith.cmpi eq, %arg1, %c0_i32 : i32
    %1 = arith.extui %0 : i1 to i32
    %c0_i32_0 = arith.constant 0 : i32
    %2 = arith.cmpi ne, %1, %c0_i32_0 : i32
    scf.if %2 {
      %cst_15 = arith.constant 0.000000e+00 : f32
      %20 = vector.broadcast %cst_15 : f32 to vector<2x128xf32>
      %c0_16 = arith.constant 0 : index
      %c0_17 = arith.constant 0 : index
      %21 = vector.load %arg8[%c0_16, %c0_17] : memref<2x128xf32, #tpu.memory_space<vmem>>, vector<2x128xf32>
      tpu.vector_store %arg8[%c0_16, %c0_17], %20 {strides = array<i32>} : memref<2x128xf32, #tpu.memory_space<vmem>>, vector<2x128xf32>,
    } else {
    }
    %c0 = arith.constant 0 : index
    %c0_1 = arith.constant 0 : index
    %3 = vector.load %arg2[%c0, %c0_1] : memref<2x128xf32, #tpu.memory_space<vmem>>, vector<2x128xf32>
    %4 = arith.truncf %3 : vector<2x128xf32> to vector<2x128xbf16>
    %c0_2 = arith.constant 0 : index
    %c0_3 = arith.constant 0 : index
    %5 = vector.load %arg3[%c0_2, %c0_3] : memref<128x128xbf16, #tpu.memory_space<vmem>>, vector<128x128xbf16>
    %cst = arith.constant dense<0.000000e+00> : vector<2x128xf32>
    %6 = tpu.matmul %4, %5, %cst {dimension_numbers = #tpu.dot_dimension_numbers<[1], [0], [0], [1], [0, 0, 1, 1], [], []>} : vector<2x128xbf16>, vector<128x128xbf16>, vector<2x128xf32> -> vector<2x128xf32>
    %c0_4 = arith.constant 0 : index
    %c0_5 = arith.constant 0 : index
    %7 = vector.load %arg4[%c0_4, %c0_5] : memref<1x128xf32, #tpu.memory_space<vmem>>, vector<1x128xf32>
    %8 = vector.broadcast %7 : vector<1x128xf32> to vector<2x128xf32>
    %9 = arith.addf %6, %8 : vector<2x128xf32>
    %10 = math.tanh %9 : vector<2x128xf32>
    %c0_6 = arith.constant 0 : index
    %c0_7 = arith.constant 0 : index
    %11 = vector.load %arg8[%c0_6, %c0_7] : memref<2x128xf32, #tpu.memory_space<vmem>>, vector<2x128xf32>
    %12 = arith.truncf %10 : vector<2x128xf32> to vector<2x128xbf16>
    %c0_8 = arith.constant 0 : index
    %c0_9 = arith.constant 0 : index
    %13 = vector.load %arg5[%c0_8, %c0_9] : memref<128x128xbf16, #tpu.memory_space<vmem>>, vector<128x128xbf16>
    %cst_10 = arith.constant dense<0.000000e+00> : vector<2x128xf32>
    %14 = tpu.matmul %12, %13, %cst_10 {dimension_numbers = #tpu.dot_dimension_numbers<[1], [0], [0], [1], [0, 0, 1, 1], [], []>} : vector<2x128xbf16>, vector<128x128xbf16>, vector<2x128xf32> -> vector<2x128xf32>
    %15 = arith.addf %11, %14 : vector<2x128xf32>
    %c0_11 = arith.constant 0 : index
    %c0_12 = arith.constant 0 : index
    %16 = vector.load %arg8[%c0_11, %c0_12] : memref<2x128xf32, #tpu.memory_space<vmem>>, vector<2x128xf32>
    tpu.vector_store %arg8[%c0_11, %c0_12], %15 {strides = array<i32>} : memref<2x128xf32, #tpu.memory_space<vmem>>, vector<2x128xf32>,
    %c0_i32_13 = arith.constant 0 : i32
    %17 = arith.cmpi eq, %arg1, %c0_i32_13 : i32
    %18 = arith.extui %17 : i1 to i32
    %c0_i32_14 = arith.constant 0 : i32
    %19 = arith.cmpi ne, %18, %c0_i32_14 : i32
    scf.if %19 {
      %c0_15 = arith.constant 0 : index
      %c0_16 = arith.constant 0 : index
      %20 = vector.load %arg8[%c0_15, %c0_16] : memref<2x128xf32, #tpu.memory_space<vmem>>, vector<2x128xf32>
      %c0_17 = arith.constant 0 : index
      %c0_18 = arith.constant 0 : index
      %21 = vector.load %arg6[%c0_17, %c0_18] : memref<1x128xf32, #tpu.memory_space<vmem>>, vector<1x128xf32>
      %22 = vector.broadcast %21 : vector<1x128xf32> to vector<2x128xf32>
      %23 = arith.addf %20, %22 : vector<2x128xf32>
      %c0_19 = arith.constant 0 : index
      %c0_20 = arith.constant 0 : index
      %24 = vector.load %arg7[%c0_19, %c0_20] : memref<2x128xf32, #tpu.memory_space<vmem>>, vector<2x128xf32>
      tpu.vector_store %arg7[%c0_19, %c0_20], %23 {strides = array<i32>} : memref<2x128xf32, #tpu.memory_space<vmem>>, vector<2x128xf32>,
    } else {
    }
    return
  }
  func.func @transform_0(%arg0: i32, %arg1: i32) -> (i32, i32) {
    %c0_i32 = arith.constant 0 : i32
    %c0_i32_0 = arith.constant 0 : i32
    return %arg0, %c0_i32 : i32, i32
  }
  func.func @transform_1(%arg0: i32, %arg1: i32) -> (i32, i32) {
    %c0_i32 = arith.constant 0 : i32
    %c0_i32_0 = arith.constant 0 : i32
    return %c0_i32, %arg1 : i32, i32
  }
  func.func @transform_2(%arg0: i32, %arg1: i32) -> (i32, i32) {
    %c0_i32 = arith.constant 0 : i32
    %c0_i32_0 = arith.constant 0 : i32
    return %c0_i32, %arg1 : i32, i32
  }
  func.func @transform_3(%arg0: i32, %arg1: i32) -> (i32, i32) {
    %c0_i32 = arith.constant 0 : i32
    %c0_i32_0 = arith.constant 0 : i32
    return %arg1, %c0_i32 : i32, i32
  }
  func.func @transform_4(%arg0: i32, %arg1: i32) -> (i32, i32) {
    %c0_i32 = arith.constant 0 : i32
    %c0_i32_0 = arith.constant 0 : i32
    %c0_i32_1 = arith.constant 0 : i32
    return %c0_i32, %c0_i32_0 : i32, i32
  }
  func.func @transform_5(%arg0: i32, %arg1: i32) -> (i32, i32) {
    %c0_i32 = arith.constant 0 : i32
    %c0_i32_0 = arith.constant 0 : i32
    return %arg0, %c0_i32 : i32, i32
  }
}

</mosaic_0001>

<bundles_post_ra>
// kernel: tpu_custom_call.1
= control target key start
LH: loop header
LB: loop body
LE: loop exit
PB: predicated region body
PF: predicated region fallthrough
CT: control target
= control target key end

     0   :  { %10 = vsyncpa [#allocation4], 0  ;;  %s561_s0 = inlined_call_operand.hbm [shape: f32[2,1024], index: 0, kind: input, shape index: {}]   ;;  %s562_s1 = inlined_call_operand.hbm [shape: bf16[128,128], index: 1, kind: input, shape index: {}]   ;;  %s563_s2 = inlined_call_operand.vmem [shape: f32[1,128], index: 2, kind: input, shape index: {}]   ;;  %s564_s3 = inlined_call_operand.hbm [shape: bf16[128,128], index: 3, kind: input, shape index: {}]   ;;  %s565_s4 = inlined_call_operand.vmem [shape: f32[1,128], index: 4, kind: input, shape index: {}]   ;;  %s566_s5 = inlined_call_operand.hbm [shape: f32[2,128], index: 5, kind: output, shape index: {}]  }
   0x1   :  { %11 = vsyncpa [#allocation7], 0 }
   0x2   :  { %12 = vsyncpa [#allocation5], 0  ;;  %s505_s18 = smov [#allocation6]  }
   0x3   :  { %s28_s19 = sshll.u32 %s505_s18, 4  ;;  %s29_s19 = int_to_ptr.vmem [resolvable:$true] %s28_s19 }
   0x4   :  { %s427_s20 = scalar_lea.vmem %s29_s19, 1024  ;;  %p432_p1 = scmp.lt.s32.totalorder %s29_s19, %s29_s19 }
   0x5   :  { %p428_p0 = scmp.ne.s32.totalorder %s29_s19, %s427_s20  ;;  %p433_p2 = scmp.lt.s32.totalorder %s427_s20, %s427_s20 }
   0x7   :  { %p434_p3 = por %p433_p2, %p432_p1 }
   0x9   :  { %p435_p4 = pnand %p434_p3, %p428_p0 }
   0xb   :  { %438 = shalt.err (!%p435_p4)
}
   0xc   :  { %s506_s21 = smov 64   ;;  %s507_s22 = smov 4  }
   0xd   :  { %34 = dma.hbm_to_vmem [thread:$0]  %s562_s1, 1024, %s29_s19, [#allocation7], %s506_s21, %s506_s21, %s507_s22  }
   0xe   :  { %s508_s25 = smov [#allocation3]   ;;  %s509_s27 = smov [#allocation8]  }
   0xf   :  { %s19_s26 = sshll.u32 %s508_s25, 4  ;;  %s42_s28 = sshll.u32 %s509_s27, 4  ;;  %s20_s26 = int_to_ptr.vmem [resolvable:$true] %s19_s26  ;;  %s43_s28 = int_to_ptr.vmem [resolvable:$true] %s42_s28 }
  0x10   :  { %s447_s29 = scalar_lea.vmem %s20_s26, 32  ;;  %p452_p6 = scmp.lt.s32.totalorder %s20_s26, %s20_s26 }
  0x11   :  { %p448_p5 = scmp.ne.s32.totalorder %s20_s26, %s447_s29  ;;  %p453_p7 = scmp.lt.s32.totalorder %s447_s29, %s447_s29 }
  0x13   :  { %p454_p8 = por %p453_p7, %p452_p6 }
  0x15   :  { %p455_p9 = pnand %p454_p8, %p448_p5 }
  0x17   :  { %458 = shalt.err (!%p455_p9)
}
  0x18   :  { %22 = dma.hbm_to_vmem [thread:$0]  %s561_s0, 32, %s20_s26, [#allocation4]  }
  0x19   :  { %s467_s7 = scalar_lea.vmem %s43_s28, 1024  ;;  %p472_p11 = scmp.lt.s32.totalorder %s43_s28, %s43_s28 }
  0x1a   :  { %p468_p10 = scmp.ne.s32.totalorder %s43_s28, %s467_s7  ;;  %p473_p12 = scmp.lt.s32.totalorder %s467_s7, %s467_s7 }
  0x1c   :  { %p474_p13 = por %p473_p12, %p472_p11 }
  0x1e   :  { %p475_p0 = pnand %p474_p13, %p468_p10 }
  0x20   :  { %478 = shalt.err (!%p475_p0)
}
  0x21   :  { %48 = dma.hbm_to_vmem [thread:$0]  %s564_s3, 1024, %s43_s28, [#allocation7], %s506_s21, %s506_s21, %s507_s22  }
  0x22   :  { %499 = dma.done.wait [#allocation4], 32  }
  0x23   :  { %500 = vsyncadd [#allocation4], 4294967264 }
  0x24   :  { %501 = dma.done.wait [#allocation7], 2048  }
  0x25   :  { %502 = vsyncadd [#allocation7], 4294965248  ;;  %v510_v0 = vmov 0.0   ;;  %vm511_vm0 = vmmov 0   ;;  %v401_v1 = vld [vmem:[#allocation6 + $0x38] sm:$0xff]   ;;  %v402_v2 = vld [vmem:[#allocation6 + $0x30] sm:$0xff]  }
  0x26   :  { %353 = vmatprep.subr.bf16.mxu0 %v510_v0  ;;  %65 = vst [vmem:[#allocation2] sm:$0x3] %v510_v0  ;;  %369 = vmatprep.mubr.msk.bf16.mxu0 %vm511_vm0, %v510_v0  ;;  %v403_v3 = vld [vmem:[#allocation6 + $0x28] sm:$0xff]   ;;  %v409_v4 = vld [vmem:[#allocation8 + $0x38] sm:$0xff]   ;;  %v404_v5 = vld [vmem:[#allocation6 + $0x20] sm:$0xff]  }
  0x27   :  { %373 = vmatprep.subr.bf16.mxu1 %v510_v0  ;;  %389 = vmatprep.mubr.msk.bf16.mxu1 %vm511_vm0, %v510_v0  ;;  %v410_v6 = vld [vmem:[#allocation8 + $0x30] sm:$0xff]   ;;  %v405_v7 = vld [vmem:[#allocation6 + $0x18] sm:$0xff]   ;;  %v411_v8 = vld [vmem:[#allocation8 + $0x28] sm:$0xff]  }
  0x28   :  { %354 = vmatpush3.bf16.msra.mxu0 %v401_v1  ;;  %374 = vmatpush3.bf16.msra.mxu1 %v409_v4  ;;  %v406_v9 = vld [vmem:[#allocation6 + $0x10] sm:$0xff]   ;;  %v407_v10 = vld [vmem:[#allocation6 + $0x8] sm:$0xff]   ;;  %v408_v11 = vld [vmem:[#allocation6] sm:$0xff]  }
  0x29   :  { %355 = vmatprep.subr.bf16.mxu0 %v510_v0  ;;  %375 = vmatprep.subr.bf16.mxu1 %v510_v0  ;;  %v66_v12 = vld [vmem:[#allocation3] sm:$0x3]  ;;  %v412_v14 = vld [vmem:[#allocation8 + $0x20] sm:$0xff]   ;;  %v414_v16 = vld [vmem:[#allocation8 + $0x10] sm:$0xff]  }
  0x2a   :  { %v67_v13 = vpack.c.bf16 %v66_v12, %v66_v12  ;;  %v413_v15 = vld [vmem:[#allocation8 + $0x18] sm:$0xff]   ;;  %v415_v17 = vld [vmem:[#allocation8 + $0x8] sm:$0xff]   ;;  %v416_v18 = vld [vmem:[#allocation8] sm:$0xff]  }
  0x2b   :  { %v317_v19 = vld [vmem:[%s563_s2] ss:$0 sm:$0xff]  ;;  %s512_s2 = smov [#allocation9]  }
  0x2c   :  { %356 = vmatpush3.bf16.msra.mxu0 %v402_v2  ;;  %376 = vmatpush3.bf16.msra.mxu1 %v410_v6  ;;  %v334_v33 = vld [vmem:[%s565_s4] ss:$0 sm:$0xff]  ;;  %s307_s11 = sshll.u32 %s512_s2, 4  ;;  %s308_s11 = int_to_ptr.vmem [resolvable:$true] %s307_s11 }
  0x2d   :  { %357 = vmatprep.subr.bf16.mxu0 %v510_v0  ;;  %377 = vmatprep.subr.bf16.mxu1 %v510_v0  ;;  %v180_v27 = vld [vmem:[#allocation2] sm:$0x3]  ;;  %s479_s12 = scalar_lea.vmem %s308_s11, 32  ;;  %p484_p2 = scmp.lt.s32.totalorder %s308_s11, %s308_s11 }
  0x2e   :  { %p480_p1 = scmp.ne.s32.totalorder %s308_s11, %s479_s12  ;;  %p485_p3 = scmp.lt.s32.totalorder %s479_s12, %s479_s12 }
  0x30   :  { %358 = vmatpush3.bf16.msra.mxu0 %v403_v3  ;;  %378 = vmatpush3.bf16.msra.mxu1 %v411_v8  ;;  %p486_p4 = por %p485_p3, %p484_p2 }
  0x31   :  { %359 = vmatprep.subr.bf16.mxu0 %v510_v0  ;;  %379 = vmatprep.subr.bf16.mxu1 %v510_v0 }
  0x32   :  { %p487_p5 = pnand %p486_p4, %p480_p1 }
  0x34   :  { %360 = vmatpush3.bf16.msra.mxu0 %v404_v5  ;;  %380 = vmatpush3.bf16.msra.mxu1 %v412_v14 }
  0x35   :  { %361 = vmatprep.subr.bf16.mxu0 %v510_v0  ;;  %381 = vmatprep.subr.bf16.mxu1 %v510_v0 }
  0x38   :  { %362 = vmatpush3.bf16.msra.mxu0 %v405_v7  ;;  %382 = vmatpush3.bf16.msra.mxu1 %v413_v15 }
  0x39   :  { %363 = vmatprep.subr.bf16.mxu0 %v510_v0  ;;  %383 = vmatprep.subr.bf16.mxu1 %v510_v0 }
  0x3c   :  { %364 = vmatpush3.bf16.msra.mxu0 %v406_v9  ;;  %384 = vmatpush3.bf16.msra.mxu1 %v414_v16 }
  0x3d   :  { %365 = vmatprep.subr.bf16.mxu0 %v510_v0  ;;  %385 = vmatprep.subr.bf16.mxu1 %v510_v0 }
  0x40   :  { %366 = vmatpush3.bf16.msra.mxu0 %v407_v10  ;;  %386 = vmatpush3.bf16.msra.mxu1 %v415_v17 }
  0x41   :  { %367 = vmatprep.subr.bf16.mxu0 %v510_v0  ;;  %387 = vmatprep.subr.bf16.mxu1 %v510_v0 }
  0x44   :  { %368 = vmatpush3.bf16.msra.mxu0 %v408_v11  ;;  %388 = vmatpush3.bf16.msra.mxu1 %v416_v18 }
  0x47   :  { %370 = vmatmul.mubr.bf16.vlgmr.msra.gmra.mxu0 %v67_v13 }
 0x107   :  { %v173_v20 = vpop.f32.mrf.mxu0 }
 0x108   :  { %v174_v21 = vadd.f32 %v317_v19, %v173_v20 }
 0x109   :  { %v371_v22 = vpop.f32.mrf.mxu0 }
 0x10a   :  { %417 = vtanh.f32 %v174_v21 }
 0x10b   :  { %v176_v23 = vpop.f32.mrf.mxu0 }
 0x10d   :  { %v372_v24 = vpop.f32.mrf.mxu0 }
 0x117   :  { %v418_v25 = vpop.eup %417 }
 0x118   :  { %v181_v26 = vpack.c.bf16 %v418_v25, %v418_v25 }
 0x11a   :  { %390 = vmatmul.mubr.bf16.vlgmr.msra.gmra.mxu1 %v181_v26 }
 0x1da   :  { %v280_v28 = vpop.f32.mrf.mxu1 }
 0x1db   :  { %v286_v29 = vadd.f32 %v280_v28, %v180_v27 }
 0x1dc   :  { %v391_v30 = vpop.f32.mrf.mxu1 }
 0x1dd   :  { %287 = vst [vmem:[#allocation2] sm:$0x3] %v286_v29 }
 0x1de   :  { %v283_v31 = vpop.f32.mrf.mxu1 }
 0x1e0   :  { %v392_v32 = vpop.f32.mrf.mxu1 }
 0x1e4   :  { %v291_v34 = vld [vmem:[#allocation2] sm:$0x3] }
 0x1e5   :  { %v299_v35 = vadd.f32 %v334_v33, %v291_v34 }
 0x1e7   :  { %300 = vst [vmem:[#allocation9] sm:$0x3] %v299_v35 }
 0x1e8   :  { %490 = shalt.err (!%p487_p5)
}
 0x1e9   :  { %310 = dma.vmem_to_hbm [thread:$0]  %s308_s11, 32, %s566_s5, [#allocation5]  }
 0x1ea   :  { %503 = dma.done.wait [#allocation5], 32  }
 0x1eb   :  { %504 = vsyncadd [#allocation5], 4294967264 }
 0x1ec   :  { %314 = vsyncpa [#allocation4], 1 }
 0x1ed   :  { %315 = vsyncpa [#allocation7], 1 }
 0x1ee   :  { %316 = vsyncpa [#allocation5], 1 }

</bundles_post_ra>
